<compile_context>
chip_gen: v7x
topology: tpu7x:2x2x1
jax: 0.10.0
libtpu: 0.0.40
codegen_flags: <defaults>
</compile_context>

<pallas_src>
import numpy as np
import jax
import jax.numpy as jnp
from jax import lax
from jax.experimental import pallas as pl
from jax.experimental.pallas import tpu as pltpu


# ----------------------------- helpers -----------------------------

def inverse_sigmoid_np(p):
    epsilon = 1e-05
    p = np.minimum(p, 1 - epsilon)
    p = np.maximum(p, epsilon)
    return np.log(p / (1 - p))


def _round_up(x, m):
    return ((x + m - 1) // m) * m


def _pick_tile(total, cap, quantum):
    """Largest multiple of `quantum` that divides `total` and is <= cap."""
    t = min(total, cap - (cap % quantum))
    t = max(t, quantum)
    while t > quantum:
        if total % t == 0:
            return t
        t -= quantum
    return quantum


def _sublane_quantum(dtype):
    # f32 -> 8, bf16/f16 -> 16, int8/fp8 -> 32 (min sublane tiling).
    return {4: 8, 2: 16, 1: 32}.get(jnp.dtype(dtype).itemsize, 8)


def _vmem_capacity_bytes():
    """Physical VMEM per core (64 MiB v7x, 128 MiB v5e/v6e)."""
    try:
        return int(pltpu.get_tpu_info().vmem_capacity_bytes)
    except Exception:
        return 64 * 1024 * 1024  # conservative fallback (v7x per-core VMEM)


def _sigmoid(x):
    # sigmoid(x) == 0.5 * (tanh(x/2) + 1): one EUP op + two cheap VALU ops,
    # exact in f32 (avoids the VALU divide expansion of a full-precision
    # reciprocal, per the review).
    return 0.5 * (jnp.tanh(0.5 * x) + 1.0)


# ------------------- path A: VMEM-resident table, one-hot MXU gather -------------------

def _plan_resident(num_examples, c_pad, batch_padded, dtype, vmem_cap):
    """Pick batch tile / example-chunk sizes; None if the table can't be resident."""
    itemsize = jnp.dtype(dtype).itemsize
    sub = _sublane_quantum(dtype)
    if num_examples <= 2048:
        ec, e_pad = num_examples, num_examples          # single matmul chunk
    else:
        ec = 1024                                       # chunk the one-hot along E
        e_pad = _round_up(num_examples, ec)
    for cap in (256, 128, 64, 32, 16, 8):               # bigger batch tiles first
        if cap < sub:
            break
        tb = _pick_tile(batch_padded, cap, sub)
        need = (e_pad * c_pad * itemsize                # resident table (single-buffered)
                + 2 * tb * c_pad * itemsize             # double-buffered output tiles
                + tb * c_pad * 4                        # f32 accumulator scratch
                + 2 * tb * ec * 4                       # one-hot / iota temporaries
                + 2 * tb * 4)                           # index tiles
        if need + (2 << 20) <= int(0.75 * vmem_cap):
            return dict(tb=tb, ec=ec, e_pad=e_pad, need=need)
    return None


def _resident_forward(logits, idx2d, plan, vmem_cap):
    num_examples, c_pad = map(int, logits.shape)
    tb, ec, e_pad = plan["tb"], plan["ec"], plan["e_pad"]
    if e_pad != num_examples:
        # Padded rows are never selected (indices < num_examples) -> zeros ok.
        logits = jnp.pad(logits, ((0, e_pad - num_examples), (0, 0)))
    batch_padded = int(idx2d.shape[0])
    n_tiles = batch_padded // tb
    nchunks = e_pad // ec

    def kernel(idx_ref, logits_hbm, out_ref, table_ref, dma_sem, acc_ref):
        # Fetch the whole table into VMEM exactly once (single-buffered; the
        # scratch persists across grid steps, hence the "arbitrary" grid axis).
        @pl.when(pl.program_id(0) == 0)
        def _():
            cp = pltpu.make_async_copy(logits_hbm, table_ref, dma_sem)
            cp.start()
            cp.wait()

        idx = idx_ref[...]                               # (tb, 1) int32 indices

        # Exact one-hot gather on the MXU (0/1 weights), replacing the serial
        # per-row copy loop.  HIGHEST precision keeps the f32 gather exact.
        if nchunks == 1:
            cols = lax.broadcasted_iota(jnp.int32, (tb, ec), 1)
            one_hot = (idx == cols).astype(table_ref.dtype)
            acc_ref[...] = jnp.dot(one_hot, table_ref[...],
                                   precision=lax.Precision.HIGHEST,
                                   preferred_element_type=jnp.float32)
        else:
            acc_ref[...] = jnp.zeros_like(acc_ref)

            def gather_chunk(c, carry):
                e0 = pl.multiple_of(c * ec, ec)
                cols = lax.broadcasted_iota(jnp.int32, (tb, ec), 1) + e0
                one_hot = (idx == cols).astype(table_ref.dtype)
                acc_ref[...] += jnp.dot(one_hot, table_ref[pl.ds(e0, ec), :],
                                        precision=lax.Precision.HIGHEST,
                                        preferred_element_type=jnp.float32)
                return carry

            lax.fori_loop(0, nchunks, gather_chunk, 0, unroll=(nchunks <= 8))

        out_ref[...] = _sigmoid(acc_ref[...]).astype(out_ref.dtype)

    vmem_limit = int(min(0.9 * vmem_cap,
                         max(1.25 * plan["need"] + (4 << 20), 8 << 20)))

    return pl.pallas_call(
        kernel,
        out_shape=jax.ShapeDtypeStruct((batch_padded, c_pad), logits.dtype),
        grid_spec=pltpu.PrefetchScalarGridSpec(
            num_scalar_prefetch=0,
            grid=(n_tiles,),
            in_specs=[
                pl.BlockSpec((tb, 1), lambda i: (i, 0)),     # per-tile indices (VMEM)
                pl.BlockSpec(memory_space=pl.ANY),           # logits stays in HBM
            ],
            out_specs=pl.BlockSpec((tb, c_pad), lambda i: (i, 0)),
            scratch_shapes=[
                pltpu.VMEM((e_pad, c_pad), logits.dtype),    # resident table (1x, not 2x)
                pltpu.SemaphoreType.DMA(()),
                pltpu.VMEM((tb, c_pad), jnp.float32),        # f32 accumulator
            ],
        ),
        compiler_params=pltpu.CompilerParams(
            # Table scratch is filled at step 0 and reused -> sequential axis.
            dimension_semantics=("arbitrary",),
            vmem_limit_bytes=vmem_limit,
        ),
    )(idx2d, logits)


# ------------------- path B: streamed row gather from HBM (class-tiled, double-buffered) -------------------

def _streaming_forward(logits, indices, vmem_cap):
    num_examples, c_pad = map(int, logits.shape)
    batch_padded = int(indices.shape[0])
    itemsize = jnp.dtype(logits.dtype).itemsize
    sub = _sublane_quantum(logits.dtype)

    tb = _pick_tile(batch_padded, 64, sub)     # rows per gather tile
    tc = _pick_tile(c_pad, 2048, 128)          # class tile (lane-dense, bounds VMEM)
    n_bt = batch_padded // tb
    n_ct = c_pad // tc
    n_steps = n_bt * n_ct

    def kernel(idx_ref, logits_hbm, out_ref, bufs, sems):
        i = pl.program_id(0)
        j = pl.program_id(1)
        step = i * n_ct + j
        slot = step % 2

        def issue(bi, cj, s):
            c0 = pl.multiple_of(cj * tc, tc)

            # All SMEM index reads + DMA starts happen before any wait.
            def start_row(r, carry):
                row = idx_ref[bi * tb + r]
                pltpu.make_async_copy(
                    logits_hbm.at[pl.ds(row, 1), pl.ds(c0, tc)],
                    bufs.at[s, pl.ds(r, 1), :],
                    sems.at[s],
                ).start()
                return carry

            lax.fori_loop(0, tb, start_row, 0, unroll=True)

        # Prime the pipeline on the very first grid step.
        @pl.when(step == 0)
        def _():
            issue(i, j, slot)

        # Prefetch the next tile's rows into the other slot before waiting on
        # the current slot, so the gather latency hides under sigmoid+writeback.
        @pl.when(step + 1 < n_steps)
        def _():
            nstep = step + 1
            issue(nstep // n_ct, nstep % n_ct, nstep % 2)

        # One wait matched to the total bytes issued into this slot (DMA
        # semaphores count bytes) instead of tb per-row waits.
        pltpu.make_async_copy(bufs.at[slot], bufs.at[slot], sems.at[slot]).wait()

        out_ref[...] = _sigmoid(bufs[slot].astype(jnp.float32)).astype(out_ref.dtype)

    need = 4 * tb * tc * itemsize + tb * tc * 4
    vmem_limit = int(min(0.9 * vmem_cap, max(1.25 * need + (4 << 20), 8 << 20)))

    return pl.pallas_call(
        kernel,
        out_shape=jax.ShapeDtypeStruct((batch_padded, c_pad), logits.dtype),
        grid_spec=pltpu.PrefetchScalarGridSpec(
            num_scalar_prefetch=1,                         # indices -> SMEM
            grid=(n_bt, n_ct),
            in_specs=[pl.BlockSpec(memory_space=pl.ANY)],  # logits stays in HBM
            out_specs=pl.BlockSpec((tb, tc), lambda i, j, idx: (i, j)),
            scratch_shapes=[
                pltpu.VMEM((2, tb, tc), logits.dtype),     # double-buffered gather
                pltpu.SemaphoreType.DMA((2,)),
            ],
        ),
        compiler_params=pltpu.CompilerParams(
            # Cross-step double buffering carries scratch state -> sequential.
            # TODO(synk): on v7x, CORE_PARALLEL on the batch axis would shard
            # across the two TensorCores but conflicts with this prefetch.
            dimension_semantics=("arbitrary", "arbitrary"),
            vmem_limit_bytes=vmem_limit,
        ),
    )(indices, logits)


# ----------------------------- public wrapper -----------------------------

def label_estimator_forward(logits, indices, *, force_stream=False):
    """sigmoid(logits[indices, :]) -- LabelEstimator.forward as Pallas kernels."""
    logits = jnp.asarray(logits)
    indices = jnp.asarray(indices).astype(jnp.int32)
    num_examples, num_classes = map(int, logits.shape)
    batch = int(indices.shape[0])
    itemsize = jnp.dtype(logits.dtype).itemsize
    sub = _sublane_quantum(logits.dtype)

    # Lane-dense classes: pad to a multiple of 128 (biggest out-spec lever).
    c_pad = _round_up(num_classes, 128)
    if c_pad != num_classes:
        # TODO(synk): for very large streamed tables, handle the ragged last
        # class tile in-kernel instead of this one-time HBM pad of the table.
        logits = jnp.pad(logits, ((0, 0), (0, c_pad - num_classes)))

    # Pad the batch only up to the sublane quantum (avoid ~2x over-padding).
    batch_padded = _round_up(max(batch, 1), sub)
    if batch_padded != batch:
        pad = jnp.zeros((batch_padded - batch,), jnp.int32)  # row 0 is always valid
        indices = jnp.concatenate([indices, pad])

    vmem_cap = _vmem_capacity_bytes()
    plan = _plan_resident(num_examples, c_pad, batch_padded, logits.dtype, vmem_cap)

    # Traffic-aware path choice: resident moves the whole table (E*C bytes),
    # streaming moves only the gathered rows (~batch*C bytes) but pays per-row
    # DMA descriptor overhead.  Prefer resident only when the table traffic is
    # comparable, rows are too narrow for efficient DMAs, or the table is tiny.
    gather_bytes = batch_padded * c_pad * itemsize
    table_bytes = num_examples * c_pad * itemsize
    row_bytes = c_pad * itemsize
    prefer_resident = (table_bytes <= 4 * gather_bytes) or (row_bytes < 2048) \
        or (num_examples <= 1024)

    if plan is not None and prefer_resident and not force_stream:
        out = _resident_forward(logits, indices.reshape(batch_padded, 1), plan, vmem_cap)
    else:
        out = _streaming_forward(logits, indices, vmem_cap)
    return out[:batch, :num_classes]


# -------------- Parameter construction (mirrors LabelEstimator.__init__) --------------

def build_logits(num_examples, num_classes, observed_label_matrix, key):
    """Replicates LabelEstimator.__init__ with estimated_labels=None (JAX RNG)."""
    w = 0.1
    q = float(inverse_sigmoid_np(0.5 + w))
    rand = jax.random.uniform(key, (num_examples, num_classes), dtype=jnp.float32)
    param_mtx = q * (2.0 * rand - 1.0)

    init_logit_pos = float(inverse_sigmoid_np(0.995))
    init_logit_neg = float(inverse_sigmoid_np(0.005))

    obs = jnp.asarray(observed_label_matrix, dtype=jnp.int8)
    param_mtx = jnp.where(obs == 1, init_logit_pos, param_mtx)
    param_mtx = jnp.where(obs == -1, init_logit_neg, param_mtx)
    return param_mtx.astype(jnp.float32)


if __name__ == "__main__":
    num_examples = 64
    num_classes = 128
    batch = 8

    key = jax.random.PRNGKey(0)
    k_obs, k_rand, k_idx = jax.random.split(key, 3)

    observed_label_matrix = jax.random.randint(
        k_obs, (num_examples, num_classes), minval=-1, maxval=2, dtype=jnp.int32
    )
    logits = build_logits(num_examples, num_classes, observed_label_matrix, k_rand)

    indices = jax.random.randint(
        k_idx, (batch,), minval=0, maxval=num_examples, dtype=jnp.int32
    )

    ref = jax.nn.sigmoid(logits[indices, :])

    # Fast path: table resident in VMEM, one-hot MXU gather.
    out = jax.block_until_ready(label_estimator_forward(logits, indices))
    np.testing.assert_allclose(np.asarray(out), np.asarray(ref), rtol=2e-5, atol=1e-6)

    # Batch that is not a multiple of the sublane quantum (padding path).
    idx_small = indices[:5]
    out_small = jax.block_until_ready(label_estimator_forward(logits, idx_small))
    np.testing.assert_allclose(
        np.asarray(out_small), np.asarray(jax.nn.sigmoid(logits[idx_small, :])),
        rtol=2e-5, atol=1e-6,
    )

    # Streaming fallback (logits in HBM, double-buffered row-gather DMAs),
    # forced for test coverage even though the demo table easily fits in VMEM.
    out_stream = jax.block_until_ready(
        label_estimator_forward(logits, indices, force_stream=True)
    )
    np.testing.assert_allclose(np.asarray(out_stream), np.asarray(ref),
                               rtol=2e-5, atol=1e-6)

    print("KERNEL_OK")
</pallas_src>

<mosaic_0001>
module attributes {stable_mosaic.version = 11 : i64} {
  func.func @kernel(%arg0: i32, %arg1: memref<8x1xi32, #tpu.memory_space<vmem>>, %arg2: memref<64x128xf32, #tpu.memory_space<any>>, %arg3: memref<8x128xf32, #tpu.memory_space<vmem>>, %arg4: memref<64x128xf32, #tpu.memory_space<vmem>>, %arg5: memref<!tpu.dma_semaphore, #tpu.memory_space<semaphore_mem>>, %arg6: memref<8x128xf32, #tpu.memory_space<vmem>>) attributes {dimension_semantics = [#tpu.dimension_semantics<arbitrary>], iteration_bounds = array<i64: 1>, scalar_prefetch = 0 : i64, scratch_operands = 3 : i64, tpu.core_type = #tpu.core_type<tc>, window_params = [{transform_indices = @transform_0, window_bounds = array<i64: 8, 1>}, {}, {transform_indices = @transform_2, window_bounds = array<i64: 8, 128>}]} {
    %c0_i32 = arith.constant 0 : i32
    %0 = arith.cmpi eq, %arg0, %c0_i32 : i32
    %1 = arith.extui %0 : i1 to i32
    %c0_i32_0 = arith.constant 0 : i32
    %2 = arith.cmpi ne, %1, %c0_i32_0 : i32
    scf.if %2 {
      tpu.enqueue_dma source(%arg2 : memref<64x128xf32, #tpu.memory_space<any>>) target(%arg4 : memref<64x128xf32, #tpu.memory_space<vmem>>) target_semaphore(%arg5 : memref<!tpu.dma_semaphore, #tpu.memory_space<semaphore_mem>>)
      tpu.wait_dma2 semaphore(%arg5 : memref<!tpu.dma_semaphore, #tpu.memory_space<semaphore_mem>>) src(%arg2 : memref<64x128xf32, #tpu.memory_space<any>>) dst(%arg4 : memref<64x128xf32, #tpu.memory_space<vmem>>)
    } else {
    }
    %c0 = arith.constant 0 : index
    %c0_1 = arith.constant 0 : index
    %3 = vector.load %arg1[%c0, %c0_1] : memref<8x1xi32, #tpu.memory_space<vmem>>, vector<8x1xi32>
    %4 = tpu.iota {dimensions = array<i32: 1>} : vector<8x64xi32>
    %5 = vector.broadcast %3 : vector<8x1xi32> to vector<8x64xi32>
    %6 = arith.cmpi eq, %5, %4 : vector<8x64xi32>
    %7 = arith.extui %6 : vector<8x64xi1> to vector<8x64xi32>
    %8 = arith.sitofp %7 : vector<8x64xi32> to vector<8x64xf32>
    %c0_2 = arith.constant 0 : index
    %c0_3 = arith.constant 0 : index
    %9 = vector.load %arg4[%c0_2, %c0_3] : memref<64x128xf32, #tpu.memory_space<vmem>>, vector<64x128xf32>
    %cst = arith.constant dense<0.000000e+00> : vector<8x128xf32>
    %10 = tpu.matmul %8, %9, %cst {dimension_numbers = #tpu.dot_dimension_numbers<[1], [0], [0], [1], [0, 0, 1, 1], [], []>, precision = #tpu.contract_precision<fp32>} : vector<8x64xf32>, vector<64x128xf32>, vector<8x128xf32> -> vector<8x128xf32>
    %c0_4 = arith.constant 0 : index
    %c0_5 = arith.constant 0 : index
    %11 = vector.load %arg6[%c0_4, %c0_5] : memref<8x128xf32, #tpu.memory_space<vmem>>, vector<8x128xf32>
    tpu.vector_store %arg6[%c0_4, %c0_5], %10 {strides = array<i32>} : memref<8x128xf32, #tpu.memory_space<vmem>>, vector<8x128xf32>,
    %c0_6 = arith.constant 0 : index
    %c0_7 = arith.constant 0 : index
    %12 = vector.load %arg6[%c0_6, %c0_7] : memref<8x128xf32, #tpu.memory_space<vmem>>, vector<8x128xf32>
    %cst_8 = arith.constant 5.000000e-01 : f32
    %13 = vector.broadcast %cst_8 : f32 to vector<8x128xf32>
    %14 = arith.mulf %13, %12 : vector<8x128xf32>
    %15 = math.tanh %14 : vector<8x128xf32>
    %cst_9 = arith.constant 1.000000e+00 : f32
    %16 = vector.broadcast %cst_9 : f32 to vector<8x128xf32>
    %17 = arith.addf %15, %16 : vector<8x128xf32>
    %cst_10 = arith.constant 5.000000e-01 : f32
    %18 = vector.broadcast %cst_10 : f32 to vector<8x128xf32>
    %19 = arith.mulf %18, %17 : vector<8x128xf32>
    %c0_11 = arith.constant 0 : index
    %c0_12 = arith.constant 0 : index
    %20 = vector.load %arg3[%c0_11, %c0_12] : memref<8x128xf32, #tpu.memory_space<vmem>>, vector<8x128xf32>
    tpu.vector_store %arg3[%c0_11, %c0_12], %19 {strides = array<i32>} : memref<8x128xf32, #tpu.memory_space<vmem>>, vector<8x128xf32>,
    return
  }
  func.func @transform_0(%arg0: i32) -> (i32, i32) {
    %c0_i32 = arith.constant 0 : i32
    %c0_i32_0 = arith.constant 0 : i32
    return %arg0, %c0_i32 : i32, i32
  }
  func.func @transform_2(%arg0: i32) -> (i32, i32) {
    %c0_i32 = arith.constant 0 : i32
    %c0_i32_0 = arith.constant 0 : i32
    return %arg0, %c0_i32 : i32, i32
  }
}

</mosaic_0001>

<bundles_post_ra>
// kernel: tpu_custom_call.1
= control target key start
LH: loop header
LB: loop body
LE: loop exit
PB: predicated region body
PF: predicated region fallthrough
CT: control target
= control target key end

     0   :  { %7 = vsyncpa [#allocation6], 0  ;;  %s924_s9 = smov [#allocation2]   ;;  %s1073_s0 = inlined_call_operand.vmem [shape: s32[8,1], index: 0, kind: input, shape index: {}]   ;;  %s1074_s1 = inlined_call_operand.hbm [shape: f32[64,128], index: 1, kind: input, shape index: {}]   ;;  %s1075_s2 = inlined_call_operand.hbm [shape: f32[8,128], index: 2, kind: output, shape index: {}]  }
   0x1   :  { %s21_s10 = sshll.u32 %s924_s9, 4  ;;  %s876_s13 = scalar_lea.hbm %s1074_s1, 1024  ;;  %s22_s10 = int_to_ptr.vmem [resolvable:$true] %s21_s10 }
   0x2   :  { %p877_p0 = scmp.ne.s32.totalorder %s1074_s1, %s876_s13  ;;  %p880_p1 = scmp.lt.u32.totalorder %s876_s13, %s1074_s1 }
   0x4   :  { %p882_p2 = pnand %p880_p1, %p877_p0 }
   0x6   :  { %885 = shalt.err (!%p882_p2)  }
   0x7   :  { %s886_s18 = scalar_lea.vmem %s22_s10, 1024  ;;  %p891_p4 = scmp.lt.s32.totalorder %s22_s10, %s22_s10 }
   0x8   :  { %p887_p3 = scmp.ne.s32.totalorder %s22_s10, %s886_s18  ;;  %p892_p5 = scmp.lt.s32.totalorder %s886_s18, %s886_s18 }
   0xa   :  { %p893_p6 = por %p892_p5, %p891_p4 }
   0xc   :  { %p894_p7 = pnand %p893_p6, %p887_p3 }
   0xe   :  { %897 = shalt.err (!%p894_p7)  }
   0xf   :  { %24 = dma.hbm_to_vmem [thread:$0]  %s1074_s1, 1024, %s22_s10, [#allocation3] }
  0x10   :  { %920 = dma.done.wait [#allocation3], 1024 }
  0x11   :  { %921 = vsyncadd [#allocation3], 4294966272  ;;  %v925_v0 = vmov 0   ;;  %v926_v1 = vmov 0.0|0.0   ;;  %v28_v2 = vld [vmem:[%s1073_s0] sm:$0xff]  ;;  %v38_v4 = vld [vmem:[#allocation2 + $0x8] sm:$0xff] }
  0x12   :  { %873 = vset.pattern.permute.xlu0 %v925_v0  ;;  %822 = vmatprep.subr.bf16.mxu0 %v926_v1  ;;  %v37_v3 = vld [vmem:[#allocation2] sm:$0xff]  ;;  %v53_v6 = vand.u32 4294901760, %v38_v4  ;;  %v39_v7 = vld [vmem:[#allocation2 + $0x10] sm:$0xff]  ;;  %v40_v8 = vld [vmem:[#allocation2 + $0x18] sm:$0xff]  ;;  %vm927_vm0 = vmmov 0   ;;  %v928_v31 = vmov 0.0  }
  0x13   :  { %786 = vmatprep.subr.bf16.mxu1 %v926_v1  ;;  %32 = vperm.xlu0 %873, %v28_v2   ;;  %v50_v5 = vand.u32 4294901760, %v37_v3  ;;  %v41_v9 = vld [vmem:[#allocation2 + $0x20] sm:$0xff]  ;;  %v56_v10 = vand.u32 4294901760, %v39_v7  ;;  %v59_v11 = vand.u32 4294901760, %v40_v8  ;;  %v42_v12 = vld [vmem:[#allocation2 + $0x28] sm:$0xff]  ;;  %v43_v14 = vld [vmem:[#allocation2 + $0x30] sm:$0xff] }
  0x14   :  { %v62_v13 = vand.u32 4294901760, %v41_v9  ;;  %v44_v15 = vld [vmem:[#allocation2 + $0x38] sm:$0xff]  ;;  %v966_v18 = vsub.f32 %v38_v4, %v53_v6  ;;  %v65_v19 = vand.u32 4294901760, %v42_v12  ;;  %v68_v25 = vand.u32 4294901760, %v43_v14  ;;  %745 = vmatprep.mubr.msk.f32.mxu0 %vm927_vm0, %v928_v31  ;;  %688 = vmatprep.mubr.msk.f32.mxu1 %vm927_vm0, %v928_v31  ;;  %s929_s0 = smov [#allocation5]  }
  0x15   :  { %v962_v16 = vpack.c.bf16 %v53_v6, %v50_v5  ;;  %v964_v17 = vsub.f32 %v37_v3, %v50_v5  ;;  %v968_v20 = vsub.f32 %v39_v7, %v56_v10  ;;  %v970_v21 = vsub.f32 %v40_v8, %v59_v11  ;;  %s599_s1 = sshll.u32 %s929_s0, 4  ;;  %s600_s1 = int_to_ptr.vmem [resolvable:$true] %s599_s1 }
  0x16   :  { %v972_v22 = vsub.f32 %v41_v9, %v62_v13  ;;  %v976_v23 = vpack.c.bf16 %v59_v11, %v56_v10  ;;  %v978_v24 = vsub.f32 %v42_v12, %v65_v19  ;;  %v71_v26 = vand.u32 4294901760, %v44_v15  ;;  %s898_s23 = scalar_lea.vmem %s600_s1, 128  ;;  %p903_p9 = scmp.lt.s32.totalorder %s600_s1, %s600_s1 }
  0x17   :  { %824 = vmatpush3.bf16.msra.mxu0 %v962_v16  ;;  %788 = vmatpush3.bf16.msra.mxu1 %v962_v16  ;;  %v135_v27 = vand.u32 4294901760, %v964_v17  ;;  %v142_v28 = vand.u32 4294901760, %v966_v18  ;;  %v984_v29 = vsub.f32 %v43_v14, %v68_v25  ;;  %v996_v35 = vpack.c.bf16 %v65_v19, %v62_v13  ;;  %p899_p8 = scmp.ne.s32.totalorder %s600_s1, %s898_s23  ;;  %p904_p10 = scmp.lt.s32.totalorder %s898_s23, %s898_s23 }
  0x18   :  { %825 = vmatprep.subr.bf16.mxu0 %v926_v1  ;;  %789 = vmatprep.subr.bf16.mxu1 %v926_v1  ;;  %v986_v30 = vsub.f32 %v44_v15, %v71_v26  ;;  %v149_v36 = vand.u32 4294901760, %v968_v20  ;;  %v156_v37 = vand.u32 4294901760, %v970_v21  ;;  %v1004_v43 = vpack.c.bf16 %v71_v26, %v68_v25 }
  0x19   :  { %v835_v32 = vpack.c.bf16 %v142_v28, %v135_v27  ;;  %v136_v33 = vsub.f32 %v964_v17, %v135_v27  ;;  %v143_v34 = vsub.f32 %v966_v18, %v142_v28  ;;  %v163_v47 = vand.u32 4294901760, %v972_v22  ;;  %p905_p11 = por %p904_p10, %p903_p9 }
  0x1a   :  { %v838_v40 = vpack.c.bf16 %v156_v37, %v149_v36  ;;  %v150_v41 = vsub.f32 %v968_v20, %v149_v36  ;;  %v157_v42 = vsub.f32 %v970_v21, %v156_v37  ;;  %v170_v48 = vand.u32 4294901760, %v978_v24 }
  0x1b   :  { %827 = vmatpush3.bf16.msra.mxu0 %v976_v23  ;;  %791 = vmatpush3.bf16.msra.mxu1 %v976_v23  ;;  %v137_v38 = vand.u32 4294901760, %v136_v33  ;;  %v144_v39 = vand.u32 4294901760, %v143_v34  ;;  %v164_v51 = vsub.f32 %v972_v22, %v163_v47  ;;  %v177_v55 = vand.u32 4294901760, %v984_v29  ;;  %p906_p12 = pnand %p905_p11, %p899_p8 }
  0x1c   :  { %828 = vmatprep.subr.bf16.mxu0 %v926_v1  ;;  %792 = vmatprep.subr.bf16.mxu1 %v926_v1  ;;  %v151_v45 = vand.u32 4294901760, %v150_v41  ;;  %v158_v46 = vand.u32 4294901760, %v157_v42  ;;  %v841_v50 = vpack.c.bf16 %v170_v48, %v163_v47  ;;  %v171_v52 = vsub.f32 %v978_v24, %v170_v48 }
  0x1d   :  { %v799_v44 = vpack.c.bf16 %v144_v39, %v137_v38  ;;  %v165_v53 = vand.u32 4294901760, %v164_v51  ;;  %v184_v56 = vand.u32 4294901760, %v986_v30  ;;  %v178_v59 = vsub.f32 %v984_v29, %v177_v55 }
  0x1e   :  { %v802_v49 = vpack.c.bf16 %v158_v46, %v151_v45  ;;  %v172_v54 = vand.u32 4294901760, %v171_v52  ;;  %v811_v0 = vpack.c.bf16 %v966_v18, %v964_v17  ;;  %v814_v2 = vpack.c.bf16 %v970_v21, %v968_v20 }
  0x1f   :  { %830 = vmatpush3.bf16.msra.mxu0 %v996_v35  ;;  %794 = vmatpush3.bf16.msra.mxu1 %v996_v35  ;;  %v844_v58 = vpack.c.bf16 %v184_v56, %v177_v55  ;;  %v185_v60 = vsub.f32 %v986_v30, %v184_v56  ;;  %v179_v61 = vand.u32 4294901760, %v178_v59  ;;  %v817_v3 = vpack.c.bf16 %v978_v24, %v972_v22 }
  0x20   :  { %831 = vmatprep.subr.bf16.mxu0 %v926_v1  ;;  %795 = vmatprep.subr.bf16.mxu1 %v926_v1  ;;  %v805_v57 = vpack.c.bf16 %v172_v54, %v165_v53  ;;  %v820_v4 = vpack.c.bf16 %v986_v30, %v984_v29  ;;  %v29_v5 = vlaneseq  ;;  %vm45_vm1 = vcmask 523264  }
  0x21   :  { %v186_v62 = vand.u32 4294901760, %v185_v60 }
  0x22   :  { %v30_v6 = vand.u32 127, %v29_v5 }
  0x23   :  { %833 = vmatpush3.bf16.msra.mxu0 %v1004_v43  ;;  %797 = vmatpush3.bf16.msra.mxu1 %v1004_v43  ;;  %v808_v63 = vpack.c.bf16 %v186_v62, %v179_v61 }
  0x24   :  { %834 = vmatprep.subr.bf16.mxu0 %v926_v1  ;;  %798 = vmatprep.subr.bf16.mxu1 %v926_v1 }
  0x92   :  { %v33_v7 = vpop.permute.xlu0 %32 }
  0x93   :  { %vm34_vm2 = vcmp.eq.s32.totalorder %v33_v7, %v30_v6 }
  0x94   :  { %v613_v8 = vsel %vm34_vm2, 1.0, %v928_v31 }
  0x95   :  { %v47_v9 = vsel %vm45_vm1, %v613_v8, 0 }
  0x96   :  { %v123_v10 = vsub.f32 %v47_v9, %v47_v9 }
  0x98   :  { %v124_v11 = vand.u32 4294901760, %v123_v10 }
  0x9a   :  { %746 = vmatmul.mubr.f32.vlgmr.msra.gmra.mrb[0].mxu0 %v124_v11  ;;  %v125_v12 = vsub.f32 %v123_v10, %v124_v11 }
  0x9b   :  { %836 = vmatpush3.bf16.msra.mxu0 %v835_v32  ;;  %764 = vmatprep.mubr.msk.f32.mxu0 %vm927_vm0, %v928_v31 }
  0x9c   :  { %837 = vmatprep.subr.bf16.mxu0 %v926_v1  ;;  %v126_v13 = vand.u32 4294901760, %v125_v12 }
  0x9e   :  { %689 = vmatmul.mubr.f32.vlgmr.msra.gmra.mrb[0].mxu1 %v126_v13 }
  0x9f   :  { %800 = vmatpush3.bf16.msra.mxu1 %v799_v44  ;;  %839 = vmatpush3.bf16.msra.mxu0 %v838_v40 }
  0xa0   :  { %801 = vmatprep.subr.bf16.mxu1 %v926_v1  ;;  %840 = vmatprep.subr.bf16.mxu0 %v926_v1 }
  0xa1   :  { %707 = vmatprep.mubr.msk.f32.mxu1 %vm927_vm0, %v928_v31 }
  0xa3   :  { %803 = vmatpush3.bf16.msra.mxu1 %v802_v49  ;;  %842 = vmatpush3.bf16.msra.mxu0 %v841_v50 }
  0xa4   :  { %804 = vmatprep.subr.bf16.mxu1 %v926_v1  ;;  %843 = vmatprep.subr.bf16.mxu0 %v926_v1 }
  0xa7   :  { %806 = vmatpush3.bf16.msra.mxu1 %v805_v57  ;;  %845 = vmatpush3.bf16.msra.mxu0 %v844_v58 }
  0xa8   :  { %807 = vmatprep.subr.bf16.mxu1 %v926_v1  ;;  %846 = vmatprep.subr.bf16.mxu0 %v926_v1 }
  0xaa   :  { %765 = vmatmul.mubr.msk.f32.vlgmr.msra.gmra.mrb[0].mxu0 %vm45_vm1, %v613_v8 }
  0xab   :  { %809 = vmatpush3.bf16.msra.mxu1 %v808_v63  ;;  %848 = vmatpush3.bf16.msra.mxu0 %v962_v16 }
  0xac   :  { %810 = vmatprep.subr.bf16.mxu1 %v926_v1  ;;  %849 = vmatprep.subr.bf16.mxu0 %v926_v1 }
  0xad   :  { %783 = vmatprep.mubr.msk.f32.mxu0 %vm927_vm0, %v928_v31 }
  0xae   :  { %708 = vmatmul.mubr.msk.f32.vlgmr.msra.gmra.mrb[0].mxu1 %vm45_vm1, %v613_v8 }
  0xaf   :  { %812 = vmatpush3.bf16.msra.mxu1 %v811_v0  ;;  %851 = vmatpush3.bf16.msra.mxu0 %v976_v23 }
  0xb0   :  { %813 = vmatprep.subr.bf16.mxu1 %v926_v1  ;;  %852 = vmatprep.subr.bf16.mxu0 %v926_v1 }
  0xb1   :  { %726 = vmatprep.mubr.msk.f32.mxu1 %vm927_vm0, %v928_v31 }
  0xb3   :  { %815 = vmatpush3.bf16.msra.mxu1 %v814_v2  ;;  %854 = vmatpush3.bf16.msra.mxu0 %v996_v35 }
  0xb4   :  { %816 = vmatprep.subr.bf16.mxu1 %v926_v1  ;;  %855 = vmatprep.subr.bf16.mxu0 %v926_v1 }
  0xb7   :  { %818 = vmatpush3.bf16.msra.mxu1 %v817_v3  ;;  %857 = vmatpush3.bf16.msra.mxu0 %v1004_v43 }
  0xb8   :  { %819 = vmatprep.subr.bf16.mxu1 %v926_v1 }
  0xba   :  { %784 = vmatmul.mubr.msk.f32.vlgmr.msra.gmra.mrb[0].mxu0 %vm45_vm1, %v613_v8 }
  0xbb   :  { %821 = vmatpush3.bf16.msra.mxu1 %v820_v4 }
  0xbe   :  { %727 = vmatmul.mubr.f32.vlgmr.msra.gmra.mrb[0].mxu1 %v123_v10 }
 0x18d   :  { %v582_v14 = vpop.f32.mrb[0].mxu0 }
 0x18e   :  { %v785_v15 = vpop.f32.mrb[1].mxu0 }
 0x191   :  { %v327_v16 = vpop.f32.mrb[0].mxu1 }
 0x192   :  { %v858_v17 = vadd.f32 %v582_v14, %v327_v16  ;;  %v728_v18 = vpop.f32.mrb[1].mxu1 }
 0x194   :  { %v588_v19 = vmul.f32 0.5, %v858_v17 }
 0x196   :  { %874 = vtanh.f32 %v588_v19 }
 0x1a0   :  { %v875_v20 = vpop.eup %874 }
 0x1a1   :  { %v590_v21 = vadd.f32 1.0, %v875_v20 }
 0x1a3   :  { %v591_v22 = vmul.f32 0.5, %v590_v21 }
 0x1a5   :  { %592 = vst [vmem:[#allocation5] sm:$0xff] %v591_v22 }
 0x1a6   :  { %909 = shalt.err (!%p906_p12)
}
 0x1a7   :  { %s910_s26 = scalar_lea.hbm %s1075_s2, 128 }
 0x1a8   :  { %p911_p13 = scmp.ne.s32.totalorder %s1075_s2, %s910_s26  ;;  %p914_p0 = scmp.lt.u32.totalorder %s910_s26, %s1075_s2 }
 0x1aa   :  { %p916_p1 = pnand %p914_p0, %p911_p13 }
 0x1ac   :  { %919 = shalt.err (!%p916_p1)
}
 0x1ad   :  { %602 = dma.vmem_to_hbm [thread:$0]  %s600_s1, 128, %s1075_s2, [#allocation6]  }
 0x1ae   :  { %922 = dma.done.wait [#allocation6], 128  }
 0x1af   :  { %923 = vsyncadd [#allocation6], 4294967168 }
 0x1b0   :  { %606 = vsyncpa [#allocation6], 1 }
 0x1b1   :  { %607 = vsyncmov [#allocation3] }
 0x1b4   :  { %s608_s5 = vpop.sfrf %607 }
 0x1b5   :  { %p617_p2 = scmp.ne.s32.totalorder %s608_s5, 0 }
 0x1b7   :  { %612 = shalt.err (%p617_p2)  }

</bundles_post_ra>
